<compile_context>
chip_gen: v7x
topology: tpu7x:2x2x1
jax: 0.10.0
libtpu: 0.0.40
codegen_flags: <defaults>
</compile_context>

<pallas_src>
import functools

import jax
import jax.numpy as jnp
from jax.experimental import pallas as pl
from jax.experimental.pallas import tpu as pltpu

EPS = 1e-5


# ----------------------------- tiling helpers -----------------------------

def _largest_divisor_le(n, cap, multiple=1):
    cap = min(cap, n)
    for c in range(cap, 0, -1):
        if n % c == 0 and c % multiple == 0:
            return c
    return None


def _pick_tt(T, V, S, Cout):
    # temporal tile for the fused GCN kernel: keep the fused-1x1 VMEM slab <= ~4 MiB,
    # and keep tt a multiple of 8 (block second-to-last-dim constraint) unless tt == T.
    budget = 4 << 20
    cap = max(8, budget // max(1, V * (S + 2) * Cout * 4))
    cap = min(cap, 128, T)
    t = _largest_divisor_le(T, cap, multiple=8)
    return t if t is not None else T   # TODO(synk): masked tail when T has no multiple-of-8 divisor


def _pick_rows(n, cap=64):
    # row tile: <= cap, exact divisor, and leave >= 2 programs for megacore when possible
    if n <= 1:
        return n
    t = _largest_divisor_le(n, min(cap, max(1, n // 2)))
    return t if t is not None else n


# ----------------------------- kernel 1: temporal mean + conv1/conv2 -----------------------------

def _mean_x12_kernel(x_ref, w12_ref, b12_ref, o_ref):
    # 1x1 convs commute with the temporal mean (both affine): mean once, then one fused matmul.
    xm = jnp.mean(x_ref[0].astype(jnp.float32), axis=1)                 # (V, Cin)
    o_ref[0] = jnp.dot(xm.astype(jnp.bfloat16), w12_ref[...],
                       preferred_element_type=jnp.float32) + b12_ref[...]


def mean_x12(x_bf, w12, b12):
    N, V, T, Cin = x_bf.shape
    C12 = w12.shape[1]
    return pl.pallas_call(
        _mean_x12_kernel,
        grid=(N,),
        in_specs=[
            pl.BlockSpec((1, V, T, Cin), lambda n: (n, 0, 0, 0)),
            pl.BlockSpec((Cin, C12), lambda n: (0, 0)),
            pl.BlockSpec((1, C12), lambda n: (0, 0)),
        ],
        out_specs=pl.BlockSpec((1, V, C12), lambda n: (n, 0, 0)),
        out_shape=jax.ShapeDtypeStruct((N, V, C12), jnp.float32),
        compiler_params=pltpu.CompilerParams(dimension_semantics=("parallel",)),
    )(x_bf, w12, b12)


# ----------------------------- kernel 2: fused unit_ctrgcn + MSTCN pointwise -----------------------------

def _gcn_fused_kernel(x_ref, x12_ref, a_ref, wbig_ref, bbig_ref, w4a_ref, b4a_ref,
                      bn_ref, wz_ref, bz_ref, o_ref,
                      adj_ref, big_ref, gacc_ref, racc_ref, *, S, R, Cout, nrelu):
    V, tt, Cin = x_ref.shape[1], x_ref.shape[2], x_ref.shape[3]
    Cbig = big_ref.shape[2]

    # ---- CTR adjacency, computed once per sample (t == 0) and kept in VMEM scratch.
    #      Safe with n 'parallel': each core recomputes it at t == 0 for every n it owns.
    @pl.when(pl.program_id(1) == 0)
    def _():
        x12 = x12_ref[0]                                                 # (V, S*2R) f32
        for s in range(S):
            x1 = x12[:, s * 2 * R: s * 2 * R + R]                        # (V, R), output joint u
            x2 = x12[:, s * 2 * R + R: (s + 1) * 2 * R]                  # (V, R), contracted joint v
            diff = jnp.tanh(x1[:, None, :] - x2[None, :, :])             # (V, V, R) == diff[u, v, r]
            y = jnp.dot(diff.reshape(V * V, R).astype(jnp.bfloat16), w4a_ref[s],
                        preferred_element_type=jnp.float32) + b4a_ref[s]
            adj_ref[s] = y.reshape(V, V, Cout) + a_ref[s]                # + A[u, v] (lane broadcast)

    # ---- fused 1x1 convs for this (n, t-tile): [x3 of S subsets | down+BN | block-residual+BN]
    big_ref[...] = (jnp.dot(x_ref[0].reshape(V * tt, Cin), wbig_ref[...],
                            preferred_element_type=jnp.float32)
                    + bbig_ref[...]).reshape(V, tt, Cbig)

    # ---- GCN aggregation: out[u,t,c] = sum_s sum_v adj_s[u,v,c] * x3_s[v,t,c]
    #      (== torch.einsum('ncuv,nctv->nctu')); accumulate into VMEM scratch.
    for s in range(S):
        x3_s = big_ref[:, :, s * Cout:(s + 1) * Cout]                    # (V, tt, Cout), indexed by v
        adj_s = adj_ref[s]                                               # (V, V, Cout)
        for u in range(V):
            contrib = jnp.sum(x3_s * adj_s[u][:, None, :], axis=0)       # (tt, Cout)
            if s == 0:
                gacc_ref[u] = contrib
            else:
                gacc_ref[u] = gacc_ref[u] + contrib

    # ---- BN + down + ReLU (end of unit_ctrgcn); keep the block residual for the TCN tail.
    sbn, tbn = bn_ref[0:1, :], bn_ref[1:2, :]
    for u in range(V):
        g = gacc_ref[u] * sbn + tbn + big_ref[u, :, S * Cout:(S + 1) * Cout]
        gacc_ref[u] = jnp.maximum(g, 0.0)
        racc_ref[u] = big_ref[u, :, (S + 1) * Cout:]

    # ---- fused MSTCN branch pointwise convs (+BN, ReLU on all but the 1x1 branch).
    z = jnp.dot(gacc_ref[...].reshape(V * tt, Cout).astype(jnp.bfloat16), wz_ref[...],
                preferred_element_type=jnp.float32) + bz_ref[...]
    col = jax.lax.broadcasted_iota(jnp.int32, z.shape, 1)
    z = jnp.where(col < nrelu, jnp.maximum(z, 0.0), z).reshape(V, tt, Cout)

    # lane-dense (N, V, T, 2*Cout) bf16 output: [z | block residual]
    o_ref[0] = jnp.concatenate([z, racc_ref[...]], axis=-1).astype(o_ref.dtype)


def gcn_fused(x_bf, x12, A4, wbig, bbig, w4a, b4a, bn2, wz, bz, *, S, R, Cout, nrelu, tt):
    N, V, T, Cin = x_bf.shape
    C12 = x12.shape[-1]
    Cbig = wbig.shape[1]
    kern = functools.partial(_gcn_fused_kernel, S=S, R=R, Cout=Cout, nrelu=nrelu)
    return pl.pallas_call(
        kern,
        grid=(N, T // tt),
        in_specs=[
            pl.BlockSpec((1, V, tt, Cin), lambda n, t: (n, 0, t, 0)),
            pl.BlockSpec((1, V, C12), lambda n, t: (n, 0, 0)),
            pl.BlockSpec((S, V, V, 1), lambda n, t: (0, 0, 0, 0)),
            pl.BlockSpec((Cin, Cbig), lambda n, t: (0, 0)),
            pl.BlockSpec((1, Cbig), lambda n, t: (0, 0)),
            pl.BlockSpec((S, R, Cout), lambda n, t: (0, 0, 0)),
            pl.BlockSpec((S, 1, Cout), lambda n, t: (0, 0, 0)),
            pl.BlockSpec((2, Cout), lambda n, t: (0, 0)),
            pl.BlockSpec((Cout, Cout), lambda n, t: (0, 0)),
            pl.BlockSpec((1, Cout), lambda n, t: (0, 0)),
        ],
        out_specs=pl.BlockSpec((1, V, tt, 2 * Cout), lambda n, t: (n, 0, t, 0)),
        out_shape=jax.ShapeDtypeStruct((N, V, T, 2 * Cout), jnp.bfloat16),
        scratch_shapes=[
            pltpu.VMEM((S, V, V, Cout), jnp.float32),        # per-sample CTR adjacency
            pltpu.VMEM((V, tt, (S + 2) * Cout), jnp.float32),  # fused 1x1 result slab
            pltpu.VMEM((V, tt, Cout), jnp.float32),          # GCN accumulator / result
            pltpu.VMEM((V, tt, Cout), jnp.float32),          # block residual
        ],
        compiler_params=pltpu.CompilerParams(
            dimension_semantics=("parallel", "arbitrary")),
    )(x_bf, x12, A4, wbig, bbig, w4a, b4a, bn2, wz, bz)


# ----------------------------- kernel 3: MSTCN temporal stage + residual + ReLU -----------------------------

def _tcn_tail_kernel(zr_ref, wt_ref, bt_ref, s2t2_ref, o_ref, zbuf_ref,
                     *, bc, kt, dils, maxpad, T, Cout):
    rt = zr_ref.shape[0]
    nbd = len(dils)

    # zero-pad the branch inputs along T inside VMEM (replaces a wrapper-level jnp.pad round-trip)
    zbuf_ref[:, :maxpad, :] = jnp.zeros((rt, maxpad, Cout), zbuf_ref.dtype)
    zbuf_ref[:, maxpad + T:, :] = jnp.zeros((rt, maxpad, Cout), zbuf_ref.dtype)
    zbuf_ref[:, maxpad:maxpad + T, :] = zr_ref[:, :, :Cout]

    outs = []
    # dilated 5x1 conv branches: per-tap accumulation (no lane-axis im2col concat)
    for bi, d in enumerate(dils):
        p = (kt + (kt - 1) * (d - 1) - 1) // 2
        acc = jnp.zeros((rt * T, bc), jnp.float32)
        for k in range(kt):
            off = maxpad - p + k * d
            tap = zbuf_ref[:, off:off + T, bi * bc:(bi + 1) * bc]         # (rt, T, bc) bf16
            acc = acc + jnp.dot(tap.reshape(rt * T, bc), wt_ref[bi, k],
                                preferred_element_type=jnp.float32)
        outs.append((acc + bt_ref[bi]).reshape(rt, T, bc))

    # 3x1 max-pool branch (+ second BN). Zero pad == -inf pad because the input is post-ReLU (>= 0).
    c0 = nbd * bc
    zm0 = zbuf_ref[:, maxpad - 1:maxpad - 1 + T, c0:c0 + bc]
    zm1 = zbuf_ref[:, maxpad:maxpad + T, c0:c0 + bc]
    zm2 = zbuf_ref[:, maxpad + 1:maxpad + 1 + T, c0:c0 + bc]
    m = jnp.maximum(jnp.maximum(zm0, zm1), zm2).astype(jnp.float32)
    outs.append(m * s2t2_ref[0:1, :] + s2t2_ref[1:2, :])

    # 1x1 branch: already conv+BN'd in the GCN kernel, pass through
    outs.append(zr_ref[:, :, (nbd + 1) * bc:Cout].astype(jnp.float32))

    res = zr_ref[:, :, Cout:].astype(jnp.float32)                         # block residual
    o_ref[...] = jnp.maximum(jnp.concatenate(outs, axis=-1) + res, 0.0)


def tcn_tail(zr, wt_all, bt_all, s2t2, *, bc, kt, dils, maxpad, Cout, rt):
    NV, T, C2 = zr.shape
    nbd = len(dils)
    Tp = T + 2 * maxpad
    kern = functools.partial(_tcn_tail_kernel, bc=bc, kt=kt, dils=tuple(dils),
                             maxpad=maxpad, T=T, Cout=Cout)
    return pl.pallas_call(
        kern,
        grid=(NV // rt,),
        in_specs=[
            pl.BlockSpec((rt, T, C2), lambda r: (r, 0, 0)),
            pl.BlockSpec((nbd, kt, bc, bc), lambda r: (0, 0, 0, 0)),
            pl.BlockSpec((nbd, 1, bc), lambda r: (0, 0, 0)),
            pl.BlockSpec((2, bc), lambda r: (0, 0)),
        ],
        out_specs=pl.BlockSpec((rt, T, Cout), lambda r: (r, 0, 0)),
        out_shape=jax.ShapeDtypeStruct((NV, T, Cout), jnp.float32),
        scratch_shapes=[pltpu.VMEM((rt, Tp, Cout), jnp.bfloat16)],
        compiler_params=pltpu.CompilerParams(dimension_semantics=("parallel",)),
    )(zr, wt_all, bt_all, s2t2)


# ----------------------------- BN folding (glue) -----------------------------

def bn_fold(gamma, beta, mean, var):
    s = gamma / jnp.sqrt(var + EPS)
    return s, beta - s * mean                    # y = s * x + t


def fold_conv_bn(w, b, gamma, beta, mean, var):
    s, t = bn_fold(gamma, beta, mean, var)
    return w * s[None, :], b * s + t


# ----------------------------- parameters -----------------------------

def make_params(key, cin, cout, V, S, rel, kt, dilations):
    keys = iter(jax.random.split(key, 128))

    def nrm(shape, scale=0.1):
        return scale * jax.random.normal(next(keys), shape, jnp.float32)

    def bn(c):
        return dict(gamma=1.0 + nrm((c,)), beta=nrm((c,)),
                    mean=nrm((c,)), var=1.0 + jnp.abs(nrm((c,))))

    p = {}
    p["ctrgc"] = [dict(w1=nrm((cin, rel)), b1=nrm((rel,)),
                       w2=nrm((cin, rel)), b2=nrm((rel,)),
                       w3=nrm((cin, cout)), b3=nrm((cout,)),
                       w4=nrm((rel, cout)), b4=nrm((cout,)))
                  for _ in range(S)]
    p["A"] = nrm((S, V, V), scale=0.5)
    p["alpha"] = jnp.float32(0.5)   # torch init is 0; nonzero value exercises the CTR path
    p["gcn_bn"] = bn(cout)
    p["down_w"], p["down_b"], p["down_bn"] = nrm((cin, cout)), nrm((cout,)), bn(cout)

    nb = len(dilations) + 2
    bc = cout // nb
    bc_rem = cout - bc * (nb - 1)
    p["tcn_branches"] = [dict(dilation=d,
                              wp=nrm((cout, bc)), bp=nrm((bc,)), bnp=bn(bc),
                              wt=nrm((kt, bc, bc)), bt=nrm((bc,)), bnt=bn(bc))
                         for d in dilations]
    p["tcn_max"] = dict(wp=nrm((cout, bc)), bp=nrm((bc,)), bnp=bn(bc), bn2=bn(bc))
    p["tcn_1x1"] = dict(wp=nrm((cout, bc_rem)), bp=nrm((bc_rem,)), bnp=bn(bc_rem))
    p["res_w"], p["res_b"], p["res_bn"] = nrm((cin, cout)), nrm((cout,)), bn(cout)
    return p


# ----------------------------- forward pass -----------------------------

def ctrgcn_block_forward(params, x_nctv):
    N, Cin, T, V = x_nctv.shape
    S = params["A"].shape[0]
    Cout = params["down_w"].shape[1]
    R = params["ctrgc"][0]["w1"].shape[1]
    alpha = params["alpha"]

    dils = tuple(b_["dilation"] for b_ in params["tcn_branches"])
    nbd = len(dils)
    nb = nbd + 2
    bc = Cout // nb
    kt = params["tcn_branches"][0]["wt"].shape[0]

    # channel-last, joint-major activations; bf16 halves HBM traffic into the matmul kernels.
    x = jnp.transpose(x_nctv, (0, 3, 2, 1)).astype(jnp.bfloat16)         # (N, V, T, Cin)

    # --- CTR branch: temporal mean + fused conv1/conv2 (one tiny kernel) ---
    w12 = jnp.concatenate([jnp.concatenate([c["w1"], c["w2"]], axis=1)
                           for c in params["ctrgc"]], axis=1)             # (Cin, S*2R)
    b12 = jnp.concatenate([jnp.concatenate([c["b1"], c["b2"]])
                           for c in params["ctrgc"]]).reshape(1, -1)
    x12 = mean_x12(x, w12.astype(jnp.bfloat16), b12)                      # (N, V, S*2R)

    # --- fused GCN kernel weights ---
    wd, bd = fold_conv_bn(params["down_w"], params["down_b"], **params["down_bn"])
    wr, br = fold_conv_bn(params["res_w"], params["res_b"], **params["res_bn"])
    wbig = jnp.concatenate([c["w3"] for c in params["ctrgc"]] + [wd, wr], axis=1)
    bbig = jnp.concatenate([c["b3"] for c in params["ctrgc"]] + [bd, br]).reshape(1, -1)
    w4a = jnp.stack([c["w4"] * alpha for c in params["ctrgc"]]).astype(jnp.bfloat16)
    b4a = jnp.stack([c["b4"] * alpha for c in params["ctrgc"]]).reshape(S, 1, Cout)
    A4 = params["A"][..., None]                                           # (S, V, V, 1)
    s_bn, t_bn = bn_fold(**params["gcn_bn"])
    bn2 = jnp.stack([s_bn, t_bn])                                         # (2, Cout)

    # MSTCN branch pointwise convs (+BN) fused into one (Cout, Cout) matmul
    wz_parts, bz_parts = [], []
    for b_ in params["tcn_branches"]:
        wf, bf = fold_conv_bn(b_["wp"], b_["bp"], **b_["bnp"])
        wz_parts.append(wf); bz_parts.append(bf)
    wf, bf = fold_conv_bn(params["tcn_max"]["wp"], params["tcn_max"]["bp"], **params["tcn_max"]["bnp"])
    wz_parts.append(wf); bz_parts.append(bf)
    wf, bf = fold_conv_bn(params["tcn_1x1"]["wp"], params["tcn_1x1"]["bp"], **params["tcn_1x1"]["bnp"])
    wz_parts.append(wf); bz_parts.append(bf)
    wz = jnp.concatenate(wz_parts, axis=1)                                # (Cout, Cout)
    bz = jnp.concatenate(bz_parts).reshape(1, -1)

    tt = _pick_tt(T, V, S, Cout)
    zr = gcn_fused(x, x12, A4, wbig.astype(jnp.bfloat16), bbig,
                   w4a, b4a, bn2, wz.astype(jnp.bfloat16), bz,
                   S=S, R=R, Cout=Cout, nrelu=(nb - 1) * bc, tt=tt)       # (N, V, T, 2*Cout) bf16

    # --- MSTCN temporal stage + block residual + final ReLU ---
    wt_all, bt_all = [], []
    for b_ in params["tcn_branches"]:
        s_t, t_t = bn_fold(**b_["bnt"])
        wt_all.append(b_["wt"] * s_t[None, None, :])
        bt_all.append((s_t * b_["bt"] + t_t).reshape(1, bc))
    wt_all = jnp.stack(wt_all).astype(jnp.bfloat16)                       # (nbd, kt, bc, bc)
    bt_all = jnp.stack(bt_all)                                            # (nbd, 1, bc)
    s2, t2 = bn_fold(**params["tcn_max"]["bn2"])
    s2t2 = jnp.stack([s2, t2])                                            # (2, bc)

    pads = [(kt + (kt - 1) * (d - 1) - 1) // 2 for d in dils]
    maxpad = max(pads + [1])
    rt = _pick_rows(N * V)
    y = tcn_tail(zr.reshape(N * V, T, 2 * Cout), wt_all, bt_all, s2t2,
                 bc=bc, kt=kt, dils=dils, maxpad=maxpad, Cout=Cout, rt=rt)  # (N*V, T, Cout)

    return y.reshape(N, V, T, Cout).transpose(0, 3, 2, 1)                 # back to (N, Cout, T, V)


# ----------------------------- demo -----------------------------

if __name__ == "__main__":
    key = jax.random.PRNGKey(0)
    kx, kp = jax.random.split(key)

    # N, Cin, Cout, T (frames), V (joints), S (graph subsets)
    N, Cin, Cout, T, V, S = 2, 8, 32, 16, 8, 3
    REL = 8 if Cin <= 16 else Cin // 8          # CTRGC rel_channels rule
    KT, DILATIONS = 5, (1, 2)                   # CTRGCNBlock defaults

    x = jax.random.normal(kx, (N, Cin, T, V), jnp.float32)
    params = make_params(kp, Cin, Cout, V, S, REL, KT, DILATIONS)

    y = ctrgcn_block_forward(params, x)
    y = jax.block_until_ready(y)

    assert y.shape == (N, Cout, T, V), y.shape
    assert bool(jnp.all(jnp.isfinite(y)))
    assert bool(jnp.all(y >= 0.0))              # final ReLU
    print("KERNEL_OK")
</pallas_src>

<mosaic_0001>
module attributes {stable_mosaic.version = 11 : i64} {
  func.func @_mean_x12_kernel(%arg0: i32, %arg1: memref<1x8x16x8xbf16, #tpu.memory_space<vmem>>, %arg2: memref<8x48xbf16, #tpu.memory_space<vmem>>, %arg3: memref<1x48xf32, #tpu.memory_space<vmem>>, %arg4: memref<1x8x48xf32, #tpu.memory_space<vmem>>) attributes {dimension_semantics = [#tpu.dimension_semantics<parallel>], iteration_bounds = array<i64: 2>, scalar_prefetch = 0 : i64, scratch_operands = 0 : i64, tpu.core_type = #tpu.core_type<tc>, window_params = [{transform_indices = @transform_0, window_bounds = array<i64: 1, 8, 16, 8>}, {pipeline_mode = #tpu.pipeline_mode<synchronous>, transform_indices = @transform_1, window_bounds = array<i64: 8, 48>}, {pipeline_mode = #tpu.pipeline_mode<synchronous>, transform_indices = @transform_2, window_bounds = array<i64: 1, 48>}, {transform_indices = @transform_3, window_bounds = array<i64: 1, 8, 48>}]} {
    %c0 = arith.constant 0 : index
    %c0_0 = arith.constant 0 : index
    %c0_1 = arith.constant 0 : index
    %c0_2 = arith.constant 0 : index
    %0 = vector.load %arg1[%c0, %c0_0, %c0_1, %c0_2] : memref<1x8x16x8xbf16, #tpu.memory_space<vmem>>, vector<1x8x16x8xbf16>
    %1 = vector.shape_cast %0 : vector<1x8x16x8xbf16> to vector<8x16x8xbf16>
    %2 = arith.extf %1 : vector<8x16x8xbf16> to vector<8x16x8xf32>
    %cst = arith.constant dense<0.000000e+00> : vector<8x8xf32>
    %3 = vector.multi_reduction <add>, %2, %cst [1] : vector<8x16x8xf32> to vector<8x8xf32>
    %cst_3 = arith.constant 1.600000e+01 : f32
    %4 = vector.broadcast %cst_3 : f32 to vector<8x8xf32>
    %5 = arith.divf %3, %4 : vector<8x8xf32>
    %6 = arith.truncf %5 : vector<8x8xf32> to vector<8x8xbf16>
    %c0_4 = arith.constant 0 : index
    %c0_5 = arith.constant 0 : index
    %7 = vector.load %arg2[%c0_4, %c0_5] : memref<8x48xbf16, #tpu.memory_space<vmem>>, vector<8x48xbf16>
    %cst_6 = arith.constant dense<0.000000e+00> : vector<8x48xf32>
    %8 = tpu.matmul %6, %7, %cst_6 {dimension_numbers = #tpu.dot_dimension_numbers<[1], [0], [0], [1], [0, 0, 1, 1], [], []>} : vector<8x8xbf16>, vector<8x48xbf16>, vector<8x48xf32> -> vector<8x48xf32>
    %c0_7 = arith.constant 0 : index
    %c0_8 = arith.constant 0 : index
    %9 = vector.load %arg3[%c0_7, %c0_8] : memref<1x48xf32, #tpu.memory_space<vmem>>, vector<1x48xf32>
    %10 = vector.broadcast %9 : vector<1x48xf32> to vector<8x48xf32>
    %11 = arith.addf %8, %10 : vector<8x48xf32>
    %c0_9 = arith.constant 0 : index
    %c0_10 = arith.constant 0 : index
    %c0_11 = arith.constant 0 : index
    %12 = vector.load %arg4[%c0_9, %c0_10, %c0_11] : memref<1x8x48xf32, #tpu.memory_space<vmem>>, vector<1x8x48xf32>
    %13 = vector.shape_cast %12 : vector<1x8x48xf32> to vector<8x48xf32>
    %14 = vector.shape_cast %11 : vector<8x48xf32> to vector<1x8x48xf32>
    tpu.vector_store %arg4[%c0_9, %c0_10, %c0_11], %14 {strides = array<i32>} : memref<1x8x48xf32, #tpu.memory_space<vmem>>, vector<1x8x48xf32>,
    return
  }
  func.func @transform_0(%arg0: i32) -> (i32, i32, i32, i32) {
    %c0_i32 = arith.constant 0 : i32
    %c0_i32_0 = arith.constant 0 : i32
    %c0_i32_1 = arith.constant 0 : i32
    %c0_i32_2 = arith.constant 0 : i32
    return %arg0, %c0_i32, %c0_i32_0, %c0_i32_1 : i32, i32, i32, i32
  }
  func.func @transform_1(%arg0: i32) -> (i32, i32) {
    %c0_i32 = arith.constant 0 : i32
    %c0_i32_0 = arith.constant 0 : i32
    %c0_i32_1 = arith.constant 0 : i32
    return %c0_i32, %c0_i32_0 : i32, i32
  }
  func.func @transform_2(%arg0: i32) -> (i32, i32) {
    %c0_i32 = arith.constant 0 : i32
    %c0_i32_0 = arith.constant 0 : i32
    %c0_i32_1 = arith.constant 0 : i32
    return %c0_i32, %c0_i32_0 : i32, i32
  }
  func.func @transform_3(%arg0: i32) -> (i32, i32, i32) {
    %c0_i32 = arith.constant 0 : i32
    %c0_i32_0 = arith.constant 0 : i32
    %c0_i32_1 = arith.constant 0 : i32
    return %arg0, %c0_i32, %c0_i32_0 : i32, i32, i32
  }
}

</mosaic_0001>

<bundles_post_ra>
// kernel: tpu_custom_call.1
= control target key start
LH: loop header
LB: loop body
LE: loop exit
PB: predicated region body
PF: predicated region fallthrough
CT: control target
= control target key end

     0   :  { %8 = vsyncpa [#allocation3], 0  ;;  %s768_s0 = inlined_call_operand.vmem [shape: bf16[2,8,16,8], index: 0, kind: input, shape index: {}]   ;;  %s769_s1 = inlined_call_operand.vmem [shape: bf16[8,48], index: 1, kind: input, shape index: {}]   ;;  %s770_s2 = inlined_call_operand.vmem [shape: f32[1,48], index: 2, kind: input, shape index: {}]   ;;  %s771_s3 = inlined_call_operand.hbm [shape: f32[2,8,48], index: 3, kind: output, shape index: {}]  }
   0x1   :  { %10 = vsyncpa [#allocation3 + $0x1], 0  ;;  %s642_s12 = smov 0   ;;  %s644_s13 = smov 0  }
   0x2   :  { %s646_s14 = smov 0   ;;  %s648_s15 = smov 0  }
   0x3 LB: > { %s663_s16 = sadd.s32 4294967295, %s617_s15   ;;  %s453_s17 = sadd.s32 4294967294, %s617_s15   ;;  %s617_s15 = sphi %s648_s15, %s777_s15   ;;  %s613_s14 = sphi %s646_s14, %s776_s14   ;;  %s609_s13 = sphi %s644_s13, %s775_s13   ;;  %s605_s12 = sphi %s642_s12, %s774_s12  }
   0x4   : > { %s667_s18 = sadd.s32 1, %s617_s15   ;;  %s91_s19 = sadd.s32 1, %s613_s14 }
   0x5   : > { %s88_s20 = ssub.s32 %s617_s15, %s667_s18  ;;  %p101_p0 = scmp.ne.s32.totalorder %s613_s14, %s609_s13 }
   0x6   : > { %p89_p1 = scmp.eq.s32.totalorder %s88_s20, 0  ;;  %p102_p2 = scmp.eq.s32.totalorder %s663_s16, 1 }
   0x7   : > { %p107_p3 = scmp.ne.s32.totalorder %s609_s13, %s605_s12  ;;  %p108_p4 = scmp.eq.s32.totalorder %s453_s17, 1 }
   0x8   : > { %s678_s21 = scalar_select %p89_p1, %s613_s14, %s91_s19  }
   0x9   : > { %p680_p5 = por %p102_p2, %p101_p0  ;;  %p684_p6 = por %p108_p4, %p107_p3 }
   0xa   : > { %p456_p7 = scmp.ge.s32.totalorder %s617_s15, 1  ;;  %p140_p8 = scmp.lt.s32.totalorder %s617_s15, 3 }
   0xc   : > { %p141_p9 = pnand %p456_p7, %p140_p8 }
   0xd   : > { %v292_v0 = vld [vmem:[%s769_s1] sm:$0xf] (!%p141_p9)  ;;  %vm334_vm0 = vcmask (!%p141_p9), 1043456   ;;  %p164_p10 = scmp.lt.s32.totalorder (!%p141_p9), %s663_s16, 1  ;;  %v619_v1 = vmov (!%p141_p9), 0.0   ;;  %vm620_vm1 = vmmov (!%p141_p9), 0  }
   0xe   : > { %144 = sbr.rel (%p141_p9) target bundleno = 293 (0x125), region = 32  ;;  %508 = vmatprep.subr.bf16.mxu0 (!%p141_p9), %v619_v1  ;;  %v336_v2 = vsel (!%p141_p9), %vm334_vm0, %v292_v0, 0  ;;  %510 = vmatprep.mubr.msk.bf16.mxu0 (!%p141_p9), %vm620_vm1, %v619_v1  ;;  %vm202_vm2 = vcmask (!%p141_p9), 64512   ;;  %vm316_vm3 = vcmask (!%p141_p9), 1041409   ;;  %vm318_vm4 = vcmask (!%p141_p9), 1042434   ;;  %s161_s4 = sand.u32 (!%p141_p9), 1, %s609_s13  }
   0xf   : > { %509 = vmatpush3.bf16.msra.mxu0 (!%p141_p9), %v336_v2  ;;  %vm320_vm5 = vcmask (!%p141_p9), 1043459   ;;  %vm322_vm6 = vcmask (!%p141_p9), 1044484   ;;  %vm324_vm7 = vcmask (!%p141_p9), 1045509   ;;  %vm326_vm8 = vcmask (!%p141_p9), 1046534   ;;  %s457_s5 = sshll.u32 (!%p141_p9), %s161_s4, 3  ;;  %s463_s8 = sshll.u32 (!%p141_p9), %s663_s16, 7 }
  0x10   : > { %vm328_vm9 = vcmask (!%p141_p9), 1047559   ;;  %s163_s9 = scalar_lea.vmem (!%p141_p9), [#allocation2], %s457_s5  ;;  %vm378_vm10 = vcmask (!%p141_p9), 392192   ;;  %s726_s19 = scalar_lea.hbm (!%p141_p9), %s771_s3, %s463_s8 }
  0x11   : > { %s394_s10 = sshll.u32 (!%p141_p9), %s163_s9, 4  ;;  %s621_s24 = smov (!%p141_p9), [#allocation2]   ;;  %s728_s10 = int_to_ptr.vmem [resolvable:$true] %s394_s10 }
  0x12   : > { %s555_s20 = scalar_lea.vmem (!%p141_p9), %s728_s10, 128  ;;  %s559_s25 = sshll.u32 (!%p141_p9), %s621_s24, 4  ;;  %s560_s25 = int_to_ptr.vmem [resolvable:$false] %s559_s25 }
  0x13   : > { %p556_p11 = scmp.ne.s32.totalorder (!%p141_p9), %s728_s10, %s555_s20  ;;  %p562_p0 = scmp.lt.s32.totalorder (!%p141_p9), %s728_s10, %s560_s25 }
  0x15   : > { %s165_s26 = scalar_select %p164_p10, %s663_s16, 1 }
  0x16   : > { %s381_s16 = scalar_lea.sflag [#allocation3], %s161_s4  ;;  %p557_p12 = pnand %p556_p11, %p680_p5 }
  0x17   : > { %s466_s27 = sshll.u32 %s165_s26, 6  ;;  %s561_s26 = scalar_lea.vmem %s560_s25, 256 }
  0x18   : > { %s168_s30 = scalar_lea.vmem %s768_s0, %s466_s27  ;;  %p558_p13 = pneg %p557_p12 }
  0x19   : > { %v468_v3 = vld [vmem:[%s168_s30] sm:$0xff]   ;;  %v499_v4 = vld [vmem:[%s168_s30 + $0x8] sm:$0xff]   ;;  %v500_v5 = vld [vmem:[%s168_s30 + $0x10] sm:$0xff]   ;;  %p563_p1 = scmp.lt.s32.totalorder %s561_s26, %s555_s20 }
  0x1a   : > { %v469_v6 = vunpack.c.l.bf16 %v468_v3  ;;  %v470_v7 = vunpack.c.h.bf16 %v468_v3  ;;  %v473_v8 = vunpack.c.l.bf16 %v499_v4  ;;  %v474_v9 = vunpack.c.h.bf16 %v499_v4  ;;  %v501_v10 = vld [vmem:[%s168_s30 + $0x18] sm:$0xff]   ;;  %v502_v11 = vld [vmem:[%s168_s30 + $0x20] sm:$0xff]   ;;  %v503_v12 = vld [vmem:[%s168_s30 + $0x28] sm:$0xff]  }
  0x1b   : > { %v477_v13 = vunpack.c.l.bf16 %v500_v5  ;;  %v478_v14 = vunpack.c.h.bf16 %v500_v5  ;;  %v481_v15 = vunpack.c.l.bf16 %v501_v10  ;;  %v482_v16 = vunpack.c.h.bf16 %v501_v10  ;;  %v504_v17 = vld [vmem:[%s168_s30 + $0x30] sm:$0xff]   ;;  %v505_v18 = vld [vmem:[%s168_s30 + $0x38] sm:$0xff]   ;;  %p564_p2 = por %p563_p1, %p562_p0 }
  0x1c   : > { %v485_v19 = vunpack.c.l.bf16 %v502_v11  ;;  %v486_v20 = vunpack.c.h.bf16 %v502_v11  ;;  %v489_v21 = vunpack.c.l.bf16 %v503_v12  ;;  %v490_v22 = vunpack.c.h.bf16 %v503_v12 }
  0x1d   : > { %v493_v23 = vunpack.c.l.bf16 %v504_v17  ;;  %v494_v24 = vunpack.c.h.bf16 %v504_v17  ;;  %v497_v25 = vunpack.c.l.bf16 %v505_v18  ;;  %v498_v26 = vunpack.c.h.bf16 %v505_v18  ;;  %p565_p3 = pnand %p564_p2, %p558_p13 }
  0x1e   : > { %v203_v27 = vsel %vm202_vm2, %v469_v6, 0.0  ;;  %v204_v28 = vsel %vm202_vm2, %v470_v7, 0.0  ;;  %v212_v29 = vsel %vm202_vm2, %v473_v8, 0.0  ;;  %v213_v30 = vsel %vm202_vm2, %v474_v9, 0.0 }
  0x1f   : > { %v205_v31 = vadd.f32 %v204_v28, %v203_v27  ;;  %v214_v32 = vadd.f32 %v213_v30, %v212_v29  ;;  %v221_v33 = vsel %vm202_vm2, %v477_v13, 0.0  ;;  %v222_v34 = vsel %vm202_vm2, %v478_v14, 0.0 }
  0x20   : > { %v223_v35 = vadd.f32 %v222_v34, %v221_v33  ;;  %v230_v36 = vsel %vm202_vm2, %v481_v15, 0.0  ;;  %v231_v37 = vsel %vm202_vm2, %v482_v16, 0.0  ;;  %v239_v38 = vsel %vm202_vm2, %v485_v19, 0.0 }
  0x21   : > { %v206_v39 = vrot.slane %v205_v31, 4  ;;  %v215_v40 = vrot.slane %v214_v32, 4  ;;  %v232_v41 = vadd.f32 %v231_v37, %v230_v36  ;;  %v240_v42 = vsel %vm202_vm2, %v486_v20, 0.0 }
  0x22   : > { %v224_v43 = vrot.slane %v223_v35, 4  ;;  %v241_v44 = vadd.f32 %v240_v42, %v239_v38  ;;  %v248_v45 = vsel %vm202_vm2, %v489_v21, 0.0  ;;  %v249_v46 = vsel %vm202_vm2, %v490_v22, 0.0 }
  0x23   : > { %v207_v47 = vadd.f32 %v206_v39, %v205_v31  ;;  %v216_v48 = vadd.f32 %v215_v40, %v214_v32  ;;  %v233_v49 = vrot.slane %v232_v41, 4  ;;  %v250_v50 = vadd.f32 %v249_v46, %v248_v45 }
  0x24   : > { %v225_v51 = vadd.f32 %v224_v43, %v223_v35  ;;  %v242_v52 = vrot.slane %v241_v44, 4  ;;  %v257_v53 = vsel %vm202_vm2, %v493_v23, 0.0  ;;  %v258_v54 = vsel %vm202_vm2, %v494_v24, 0.0 }
  0x25   : > { %v208_v55 = vrot.slane %v207_v47, 2  ;;  %v217_v56 = vrot.slane %v216_v48, 2  ;;  %v234_v57 = vadd.f32 %v233_v49, %v232_v41  ;;  %v251_v58 = vrot.slane %v250_v50, 4 }
  0x26   : > { %v226_v59 = vrot.slane %v225_v51, 2  ;;  %v243_v60 = vadd.f32 %v242_v52, %v241_v44  ;;  %v259_v61 = vadd.f32 %v258_v54, %v257_v53  ;;  %v266_v62 = vsel %vm202_vm2, %v497_v25, 0.0 }
  0x27   : > { %v209_v63 = vadd.f32 %v208_v55, %v207_v47  ;;  %v218_v0 = vadd.f32 %v217_v56, %v216_v48  ;;  %v235_v1 = vrot.slane %v234_v57, 2  ;;  %v252_v2 = vadd.f32 %v251_v58, %v250_v50 }
  0x28   : > { %v227_v3 = vadd.f32 %v226_v59, %v225_v51  ;;  %v244_v4 = vrot.slane %v243_v60, 2  ;;  %v260_v5 = vrot.slane %v259_v61, 4  ;;  %v267_v6 = vsel %vm202_vm2, %v498_v26, 0.0 }
  0x29   : > { %v210_v7 = vrot.slane %v209_v63, 1  ;;  %v219_v8 = vrot.slane %v218_v0, 1  ;;  %v236_v9 = vadd.f32 %v235_v1, %v234_v57  ;;  %v253_v10 = vrot.slane %v252_v2, 2 }
  0x2a   : > { %v228_v11 = vrot.slane %v227_v3, 1  ;;  %v245_v12 = vadd.f32 %v244_v4, %v243_v60  ;;  %v261_v13 = vadd.f32 %v260_v5, %v259_v61  ;;  %v268_v14 = vadd.f32 %v267_v6, %v266_v62 }
  0x2b   : > { %v211_v15 = vadd.f32 %v210_v7, %v209_v63  ;;  %v220_v16 = vadd.f32 %v219_v8, %v218_v0  ;;  %v237_v17 = vrot.slane %v236_v9, 1  ;;  %v254_v18 = vadd.f32 %v253_v10, %v252_v2 }
  0x2c   : > { %v229_v19 = vadd.f32 %v228_v11, %v227_v3  ;;  %v246_v20 = vrot.slane %v245_v12, 1  ;;  %v262_v21 = vrot.slane %v261_v13, 2  ;;  %v269_v22 = vrot.slane %v268_v14, 4  ;;  %v460_v3 = vld [vmem:[%s770_s2] ss:$0 sm:$0xff] }
  0x2d   : > { %v238_v23 = vadd.f32 %v237_v17, %v236_v9  ;;  %v255_v24 = vrot.slane %v254_v18, 1  ;;  %v276_v25 = vmul.f32 0.0625, %v211_v15  ;;  %v277_v26 = vmul.f32 0.0625, %v220_v16 }
  0x2e   : > { %v247_v27 = vadd.f32 %v246_v20, %v245_v12  ;;  %v263_v28 = vadd.f32 %v262_v21, %v261_v13  ;;  %v270_v29 = vadd.f32 %v269_v22, %v268_v14  ;;  %v278_v30 = vmul.f32 0.0625, %v229_v19 }
  0x2f   : > { %v256_v31 = vadd.f32 %v255_v24, %v254_v18  ;;  %v279_v32 = vmul.f32 0.0625, %v238_v23  ;;  %v284_v33 = vpack.c.bf16 %v276_v25, %v276_v25  ;;  %v285_v34 = vpack.c.bf16 %v277_v26, %v277_v26 }
  0x30   : > { %v264_v35 = vrot.slane %v263_v28, 1  ;;  %v271_v36 = vrot.slane %v270_v29, 2  ;;  %v280_v37 = vmul.f32 0.0625, %v247_v27  ;;  %v286_v38 = vpack.c.bf16 %v278_v30, %v278_v30 }
  0x31   : > { %v281_v39 = vmul.f32 0.0625, %v256_v31  ;;  %v287_v40 = vpack.c.bf16 %v279_v32, %v279_v32  ;;  %v308_v41 = vunpack.c.l.b16 %v284_v33  ;;  %v309_v42 = vunpack.c.l.b16 %v285_v34 }
  0x32   : > { %v265_v43 = vadd.f32 %v264_v35, %v263_v28  ;;  %v272_v44 = vadd.f32 %v271_v36, %v270_v29  ;;  %v288_v45 = vpack.c.bf16 %v280_v37, %v280_v37  ;;  %v310_v46 = vunpack.c.l.b16 %v286_v38 }
  0x33   : > { %v289_v47 = vpack.c.bf16 %v281_v39, %v281_v39  ;;  %v311_v48 = vunpack.c.l.b16 %v287_v40  ;;  %v317_v49 = vsel %vm316_vm3, %v309_v42, %v308_v41 }
  0x34   : > { %v273_v50 = vrot.slane %v272_v44, 1  ;;  %v282_v51 = vmul.f32 0.0625, %v265_v43  ;;  %v312_v52 = vunpack.c.l.b16 %v288_v45  ;;  %v319_v53 = vsel %vm318_vm4, %v310_v46, %v317_v49 }
  0x35   : > { %v313_v54 = vunpack.c.l.b16 %v289_v47  ;;  %v321_v55 = vsel %vm320_vm5, %v311_v48, %v319_v53 }
  0x36   : > { %v274_v56 = vadd.f32 %v273_v50, %v272_v44  ;;  %v290_v57 = vpack.c.bf16 %v282_v51, %v282_v51  ;;  %v323_v58 = vsel %vm322_vm6, %v312_v52, %v321_v55 }
  0x37   : > { %v325_v61 = vsel %vm324_vm7, %v313_v54, %v323_v58 }
  0x38   : > { %v283_v59 = vmul.f32 0.0625, %v274_v56  ;;  %v314_v60 = vunpack.c.l.b16 %v290_v57 }
  0x3a   : > { %v291_v62 = vpack.c.bf16 %v283_v59, %v283_v59  ;;  %v327_v63 = vsel %vm326_vm8, %v314_v60, %v325_v61 }
  0x3c   : > { %v315_v0 = vunpack.c.l.b16 %v291_v62 }
  0x3e   : > { %v329_v1 = vsel %vm328_vm9, %v315_v0, %v327_v63 }
  0x3f   : > { %v330_v2 = vpack.c.b16 %v329_v1, %v329_v1 }
  0x41   : > { %511 = vmatmul.mubr.msk.bf16.vlgmr.msra.gmra.mrb[0].mxu0 %vm202_vm2, %v330_v2 }
 0x114   : > { %v372_v4 = vpop.f32.mrb[0].mxu0 }
 0x115   : > { %v373_v5 = vadd.f32 %v460_v3, %v372_v4  ;;  %v512_v6 = vpop.f32.mrb[1].mxu0 }
 0x116   : > { %v375_v7 = vpop.f32.mrb[2].mxu0 }
 0x117   : > { %v513_v8 = vpop.f32.mrb[3].mxu0  ;;  %379 = vst.msk [vmem:[%s163_s9] sm:$0xff] %vm378_vm10, %v373_v5 }
 0x118   : > { %568 = shalt.err (!%p565_p3)
}
 0x119   : > { %s569_s27 = scalar_lea.hbm %s726_s19, 128  ;;  %s573_s30 = scalar_lea.hbm %s771_s3, 256 }
 0x11a   : > { %p570_p4 = scmp.ne.s32.totalorder %s726_s19, %s569_s27  ;;  %p574_p9 = scmp.lt.u32.totalorder %s726_s19, %s771_s3 }
 0x11b   : > { %p575_p10 = scmp.lt.u32.totalorder %s573_s30, %s569_s27  ;;  %p577_p12 = scmp.lt.u32.totalorder %s569_s27, %s726_s19 }
 0x11c   : > { %p571_p7 = pnand %p570_p4, %p680_p5 }
 0x11d   : > { %p576_p11 = por %p575_p10, %p574_p9 }
 0x11e   : > { %p572_p8 = pneg %p571_p7 }
 0x11f   : > { %p578_p13 = por %p577_p12, %p576_p11 }
 0x121   : > { %p579_p0 = pnand %p578_p13, %p572_p8 }
 0x123   : > { %582 = shalt.err (!%p579_p0)
}
 0x124   : > { %514 = dma.vmem_to_hbm [thread:$0]  (%p680_p5), %s728_s10, 128, %s726_s19, %s381_s16  }
 0x125 PF: > { %p520_p1 = scmp.ge.s32.totalorder %s617_s15, 2  ;;  %s406_s6 = sand.u32 1, %s605_s12  }
 0x126   : > { %s407_s7 = scalar_lea.sflag [#allocation3], %s406_s6 }
 0x127   : > { %p517_p2 = pnand %p520_p1, %p684_p6 }
 0x129   : > { %600 = dma.done.wait (!%p517_p2), %s407_s7, 128  }
 0x12a   : > { %602 = vsyncadd (!%p517_p2), %s407_s7, 4294967168  ;;  %p13_p3 = scmp.ge.s32.totalorder %s667_s18, 4   ;;  %s774_s12 = smov %s609_s13 }
 0x12b   : > { %s775_s13 = smov %s613_s14  ;;  %s776_s14 = smov %s678_s21 }
 0x12c   : > { %s777_s15 = smov %s667_s18  ;;  %15 = sbr.rel (!%p13_p3) target bundleno = 3 (0x3), region = 67 }
 0x133   :  { %412 = vsyncpa [#allocation3], 1 }
 0x134   :  { %414 = vsyncpa [#allocation3 + $0x1], 1 }

</bundles_post_ra>
